<compile_context>
chip_gen: v5e
topology: v5e:2x2
jax: 0.10.0
libtpu: 0.0.40
codegen_flags: <defaults>
</compile_context>

<pallas_src>
import math
import functools

import jax
import jax.numpy as jnp
from jax import lax
from jax.experimental import pallas as pl
from jax.experimental.pallas import tpu as pltpu


# ============================================================================
# Tiled linear (nn.Linear) kernel:  out = x @ W + b
# ============================================================================
def _matmul_bias_kernel(x_ref, w_ref, b_ref, o_ref, acc_ref):
    @pl.when(pl.program_id(2) == 0)
    def _():
        acc_ref[...] = jnp.zeros_like(acc_ref)

    # Operands in their native dtype (f32 or bf16); accumulate in f32.
    acc_ref[...] += jnp.dot(x_ref[...], w_ref[...],
                            preferred_element_type=jnp.float32)

    @pl.when(pl.program_id(2) == pl.num_programs(2) - 1)
    def _():
        o_ref[...] = (acc_ref[...] + b_ref[...].astype(jnp.float32)
                      ).astype(o_ref.dtype)


def _tile_and_pad(dim, target, align):
    """Return (tile, padded_dim).  tile == dim (full, always legal) when
    dim <= target; otherwise an `align`-multiple tile with the dim padded up."""
    if dim <= target:
        return dim, dim
    tile = max(align, (target // align) * align)
    padded = ((dim + tile - 1) // tile) * tile
    return tile, padded


def pallas_linear(x, w, b, *, tm=256, tn=256, tk=512):
    """x: (M, K), w: (K, N), b: (N,) -> (M, N).  Tiles are (8,128)-aligned; the
    inputs are zero-padded if needed and the output sliced back."""
    M, K = x.shape
    N = w.shape[1]
    tm, Mp = _tile_and_pad(M, tm, 8)
    tn, Np = _tile_and_pad(N, tn, 128)
    tk, Kp = _tile_and_pad(K, tk, 128)

    if (Mp, Kp) != (M, K):
        x = jnp.pad(x, ((0, Mp - M), (0, Kp - K)))
    if (Kp, Np) != (K, N):
        w = jnp.pad(w, ((0, Kp - K), (0, Np - N)))
    if Np != N:
        b = jnp.pad(b, (0, Np - N))

    grid = (Mp // tm, Np // tn, Kp // tk)
    out = pl.pallas_call(
        _matmul_bias_kernel,
        out_shape=jax.ShapeDtypeStruct((Mp, Np), x.dtype),
        grid=grid,
        in_specs=[
            pl.BlockSpec((tm, tk), lambda i, j, k: (i, k)),
            pl.BlockSpec((tk, tn), lambda i, j, k: (k, j)),
            pl.BlockSpec((1, tn), lambda i, j, k: (0, j)),
        ],
        out_specs=pl.BlockSpec((tm, tn), lambda i, j, k: (i, j)),
        scratch_shapes=[pltpu.VMEM((tm, tn), jnp.float32)],
        compiler_params=pltpu.CompilerParams(
            dimension_semantics=("parallel", "parallel", "arbitrary")),
    )(x, w, b.reshape(1, Np))

    if (Mp, Np) != (M, N):
        out = out[:M, :N]
    return out


# ============================================================================
# Attention kernels
# ============================================================================
def _seq_tile(dim, target, align):
    """Largest tile <= target that divides dim and is a multiple of `align`;
    falls back to the full dim (always legal) if none exists."""
    if dim <= target:
        return dim
    t = (max(target, align) // align) * align
    for cand in range(t, align - 1, -align):
        if dim % cand == 0:
            return cand
    return dim


def _attn_weights_kernel(*refs, num_heads, depth, scale, have_mask):
    """Per-(batch, q-tile) step: full Skv per block, per-head loop, writes both
    the attention output slab and the (H, tq, Skv) attention weights."""
    q_ref, k_ref, v_ref = refs[0], refs[1], refs[2]
    idx = 3
    mask_ref = None
    if have_mask:
        mask_ref = refs[idx]
        idx += 1
    o_ref, w_ref = refs[idx], refs[idx + 1]

    # Fold 1/sqrt(depth) into q once: O(tq*d_model) instead of O(tq*Skv).
    q = q_ref[0] * jnp.asarray(scale, q_ref.dtype)          # (tq, d_model)
    k = k_ref[0]                                             # (Skv, d_model)
    v = v_ref[0]                                             # (Skv, d_model)
    masked = (mask_ref[0] == 0) if have_mask else None       # (tq, Skv) bool

    for h in range(num_heads):
        lo = h * depth
        # q_h @ k_h^T without materializing a transposed K tile.
        s = lax.dot_general(q[:, lo:lo + depth], k[:, lo:lo + depth],
                            (((1,), (1,)), ((), ())),
                            preferred_element_type=jnp.float32)  # (tq, Skv)
        if have_mask:
            s = jnp.where(masked, jnp.float32(-1e9), s)      # reference semantics

        m = jnp.max(s, axis=-1, keepdims=True)
        e = jnp.exp(s - m)
        p = e * pl.reciprocal(jnp.sum(e, axis=-1, keepdims=True), approx=True)

        w_ref[0, h] = p.astype(w_ref.dtype)
        # Per-head direct store into the output block (no concatenate).
        o_ref[0, :, lo:lo + depth] = jnp.dot(
            p.astype(v.dtype), v[:, lo:lo + depth],
            preferred_element_type=jnp.float32).astype(o_ref.dtype)


def _flash_attn_kernel(*refs, num_heads, depth, scale, have_mask):
    """Flash-style online softmax over KV tiles; never materializes the full
    (Sq, Skv) scores and never writes attention weights to HBM."""
    q_ref, k_ref, v_ref = refs[0], refs[1], refs[2]
    idx = 3
    mask_ref = None
    if have_mask:
        mask_ref = refs[idx]
        idx += 1
    o_ref = refs[idx]
    m_sc, l_sc, acc_sc = refs[idx + 1], refs[idx + 2], refs[idx + 3]

    ki = pl.program_id(2)

    @pl.when(ki == 0)
    def _():
        m_sc[...] = jnp.full(m_sc.shape, -jnp.inf, m_sc.dtype)
        l_sc[...] = jnp.zeros(l_sc.shape, l_sc.dtype)
        acc_sc[...] = jnp.zeros(acc_sc.shape, acc_sc.dtype)

    q = q_ref[0] * jnp.asarray(scale, q_ref.dtype)          # (tq, d_model)
    k = k_ref[0]                                             # (tkv, d_model)
    v = v_ref[0]
    masked = (mask_ref[0] == 0) if have_mask else None       # (tq, tkv) bool

    for h in range(num_heads):
        lo = h * depth
        s = lax.dot_general(q[:, lo:lo + depth], k[:, lo:lo + depth],
                            (((1,), (1,)), ((), ())),
                            preferred_element_type=jnp.float32)  # (tq, tkv)
        if have_mask:
            s = jnp.where(masked, jnp.float32(-1e9), s)

        m_prev = m_sc[:, h:h + 1]                            # (tq, 1)
        m_new = jnp.maximum(m_prev, jnp.max(s, axis=-1, keepdims=True))
        alpha = jnp.exp(m_prev - m_new)
        p = jnp.exp(s - m_new)

        l_sc[:, h:h + 1] = alpha * l_sc[:, h:h + 1] + jnp.sum(p, axis=-1,
                                                              keepdims=True)
        acc_sc[:, lo:lo + depth] = (
            alpha * acc_sc[:, lo:lo + depth]
            + jnp.dot(p.astype(v.dtype), v[:, lo:lo + depth],
                      preferred_element_type=jnp.float32))
        m_sc[:, h:h + 1] = m_new

    @pl.when(ki == pl.num_programs(2) - 1)
    def _():
        inv = pl.reciprocal(l_sc[...], approx=True)          # (tq, H)
        for h in range(num_heads):
            lo = h * depth
            acc_sc[:, lo:lo + depth] = acc_sc[:, lo:lo + depth] * inv[:, h:h + 1]
        # Single lane-dense (tq, d_model) store.
        o_ref[0] = acc_sc[...].astype(o_ref.dtype)


def pallas_attention(q, k, v, mask=None, *, num_heads, return_weights=True,
                     fused_qkv=False, q_block=None, kv_block=None):
    """q/k/v: (B, S, d_model) — or, with fused_qkv=True, all three are the same
    (B, S, 3*d_model) buffer and BlockSpecs column-select q/k/v out of it.
    mask: optional (B, Sq, Skv) 0/1 tensor (0 = masked).
    Returns (attn_out (B,Sq,d_model), attn_weights (B,H,Sq,Skv) or None)."""
    B, Sq, width = q.shape
    d_model = width // 3 if fused_qkv else width
    Skv = k.shape[1]
    depth = d_model // num_heads
    scale = 1.0 / math.sqrt(depth)
    have_mask = mask is not None
    isz = q.dtype.itemsize
    msz = mask.dtype.itemsize if have_mask else 0
    cols = (0, 1, 2) if fused_qkv else (0, 0, 0)
    mib = 1024 * 1024

    if return_weights:
        # tq chosen so the double-buffered (H, tq, Skv) weights block (plus the
        # other blocks) stays within ~20 MiB.
        if q_block is None:
            per_row = 2 * (num_heads * Skv * 4 + Skv * msz + 2 * d_model * isz) + 1
            target = max(8, min(256, (20 * mib) // per_row))
        else:
            target = q_block
        tq = _seq_tile(Sq, target, 8)
        grid = (B, Sq // tq)

        kernel = functools.partial(_attn_weights_kernel, num_heads=num_heads,
                                   depth=depth, scale=scale, have_mask=have_mask)
        in_specs = [
            pl.BlockSpec((1, tq, d_model), lambda b, qi, c=cols[0]: (b, qi, c)),
            pl.BlockSpec((1, Skv, d_model), lambda b, qi, c=cols[1]: (b, 0, c)),
            pl.BlockSpec((1, Skv, d_model), lambda b, qi, c=cols[2]: (b, 0, c)),
        ]
        args = [q, k, v]
        if have_mask:
            in_specs.append(pl.BlockSpec((1, tq, Skv), lambda b, qi: (b, qi, 0)))
            args.append(mask)
        out_shape = (jax.ShapeDtypeStruct((B, Sq, d_model), q.dtype),
                     jax.ShapeDtypeStruct((B, num_heads, Sq, Skv), jnp.float32))
        out_specs = (pl.BlockSpec((1, tq, d_model), lambda b, qi: (b, qi, 0)),
                     pl.BlockSpec((1, num_heads, tq, Skv),
                                  lambda b, qi: (b, 0, qi, 0)))

        est = 2 * (2 * tq * d_model * isz + 2 * Skv * d_model * isz
                   + tq * Skv * msz + num_heads * tq * Skv * 4)
        vmem_limit = int(min(max(est * 1.25, 32 * mib), 100 * mib))

        out, w = pl.pallas_call(
            kernel, out_shape=out_shape, grid=grid,
            in_specs=in_specs, out_specs=out_specs,
            compiler_params=pltpu.CompilerParams(
                dimension_semantics=("parallel", "parallel"),
                vmem_limit_bytes=vmem_limit),
        )(*args)
        return out, w

    # ---- flash (online-softmax) path: no weights writeback at all ----------
    tq = _seq_tile(Sq, 256 if q_block is None else q_block, 8)
    tkv = _seq_tile(Skv, 256 if kv_block is None else kv_block, 128)
    grid = (B, Sq // tq, Skv // tkv)

    kernel = functools.partial(_flash_attn_kernel, num_heads=num_heads,
                               depth=depth, scale=scale, have_mask=have_mask)
    in_specs = [
        pl.BlockSpec((1, tq, d_model), lambda b, qi, ki, c=cols[0]: (b, qi, c)),
        pl.BlockSpec((1, tkv, d_model), lambda b, qi, ki, c=cols[1]: (b, ki, c)),
        pl.BlockSpec((1, tkv, d_model), lambda b, qi, ki, c=cols[2]: (b, ki, c)),
    ]
    args = [q, k, v]
    if have_mask:
        in_specs.append(pl.BlockSpec((1, tq, tkv),
                                     lambda b, qi, ki: (b, qi, ki)))
        args.append(mask)
    out_specs = pl.BlockSpec((1, tq, d_model), lambda b, qi, ki: (b, qi, 0))

    est = (2 * (2 * tq * d_model * isz + 2 * tkv * d_model * isz
                + tq * tkv * msz)
           + (2 * tq * max(num_heads, 128) + tq * d_model) * 4)
    vmem_limit = int(min(max(est * 1.25, 32 * mib), 100 * mib))

    out = pl.pallas_call(
        kernel,
        out_shape=jax.ShapeDtypeStruct((B, Sq, d_model), q.dtype),
        grid=grid, in_specs=in_specs, out_specs=out_specs,
        scratch_shapes=[pltpu.VMEM((tq, num_heads), jnp.float32),   # running max
                        pltpu.VMEM((tq, num_heads), jnp.float32),   # running sum
                        pltpu.VMEM((tq, d_model), jnp.float32)],    # accumulator
        compiler_params=pltpu.CompilerParams(
            dimension_semantics=("parallel", "parallel", "arbitrary"),
            vmem_limit_bytes=vmem_limit),
    )(*args)
    return out, None


# ============================================================================
# MultiHeadAttention module (parameter init + forward)
# ============================================================================
def init_mha_params(key, d_model):
    """Deterministic init mimicking nn.Linear's uniform(-1/sqrt(fan_in), ...).
    Fused QKV weights are prepared once here (not per forward call)."""
    bound = 1.0 / math.sqrt(d_model)
    ks = jax.random.split(key, 8)

    def lin(kw, kb):
        w = jax.random.uniform(kw, (d_model, d_model), jnp.float32, -bound, bound)
        b = jax.random.uniform(kb, (d_model,), jnp.float32, -bound, bound)
        return w, b

    params = {
        "q": lin(ks[0], ks[1]),
        "k": lin(ks[2], ks[3]),
        "v": lin(ks[4], ks[5]),
        "o": lin(ks[6], ks[7]),
    }
    params["qkv"] = (
        jnp.concatenate([params["q"][0], params["k"][0], params["v"][0]], axis=1),
        jnp.concatenate([params["q"][1], params["k"][1], params["v"][1]], axis=0),
    )
    return params


def multi_head_attention(params, query, key, value, num_heads, mask=None,
                         return_weights=True, q_block=None, kv_block=None):
    """query: (B, Sq, d_model); key/value: (B, Skv, d_model);
    mask: optional (B, Sq, Skv), 0 = masked.
    Returns (mha_out (B,Sq,d_model), attention_weights (B,H,Sq,Skv) or None)."""
    B, Sq, d_model = query.shape
    Skv = key.shape[1]

    # NOTE: the self-attention fast path keys on Python object identity, so
    # under jit/vmap distinct tracers fall back to separate projections
    # (perf only, numerics identical).
    self_attention = (query is key) and (key is value) and ("qkv" in params)
    if self_attention:
        w_qkv, b_qkv = params["qkv"]
        qkv = pallas_linear(query.reshape(B * Sq, d_model), w_qkv, b_qkv
                            ).reshape(B, Sq, 3 * d_model)
        if d_model % 128 == 0:
            # Zero-copy: BlockSpecs column-select q/k/v out of the fused buffer.
            q = k = v = qkv
            fused = True
        else:
            q = qkv[:, :, :d_model]
            k = qkv[:, :, d_model:2 * d_model]
            v = qkv[:, :, 2 * d_model:]
            fused = False
    else:
        wq, bq = params["q"]
        wk, bk = params["k"]
        wv, bv = params["v"]
        q = pallas_linear(query.reshape(B * Sq, d_model), wq, bq
                          ).reshape(B, Sq, d_model)
        k = pallas_linear(key.reshape(B * Skv, d_model), wk, bk
                          ).reshape(B, Skv, d_model)
        v = pallas_linear(value.reshape(B * Skv, d_model), wv, bv
                          ).reshape(B, Skv, d_model)
        fused = False

    # Stream the mask as a 0/1 bf16 tensor (half the HBM bytes of an f32 bias);
    # the kernel applies where(mask==0, -1e9, scores), matching the reference
    # exactly (including fully-masked rows).
    mask_b = None if mask is None else (mask != 0).astype(jnp.bfloat16)

    attn_out, attn_weights = pallas_attention(
        q, k, v, mask_b, num_heads=num_heads, return_weights=return_weights,
        fused_qkv=fused, q_block=q_block, kv_block=kv_block)

    wo, bo = params["o"]
    mha_out = pallas_linear(attn_out.reshape(B * Sq, d_model), wo, bo
                            ).reshape(B, Sq, d_model)
    return mha_out, attn_weights


# ============================================================================
# Pure-JAX reference for correctness checks
# ============================================================================
def reference_mha(params, query, key, value, num_heads, mask=None):
    B, Sq, d_model = query.shape
    depth = d_model // num_heads

    def proj(x, wb):
        w, b = wb
        bs, s, _ = x.shape
        return (x @ w + b).reshape(bs, s, num_heads, depth).transpose(0, 2, 1, 3)

    q = proj(query, params["q"])
    k = proj(key, params["k"])
    v = proj(value, params["v"])
    scores = jnp.einsum("bhqd,bhkd->bhqk", q, k) / math.sqrt(depth)
    if mask is not None:
        scores = jnp.where(mask[:, None, :, :] == 0, -1e9, scores)
    w = jax.nn.softmax(scores, axis=-1)
    out = jnp.einsum("bhqk,bhkd->bhqd", w, v)
    out = out.transpose(0, 2, 1, 3).reshape(B, Sq, d_model)
    w_o, b_o = params["o"]
    return out @ w_o + b_o, w


if __name__ == "__main__":
    tol = dict(atol=5e-3, rtol=5e-3)

    # small shapes: batch=2, seq=8, d_model=32, heads=4 (depth=8)
    B, S, d_model, num_heads = 2, 8, 32, 4
    root = jax.random.PRNGKey(0)
    k_params, k_q, k_k, k_v = jax.random.split(root, 4)

    params = init_mha_params(k_params, d_model)
    query = jax.random.normal(k_q, (B, S, d_model), jnp.float32)
    key = jax.random.normal(k_k, (B, S, d_model), jnp.float32)
    value = jax.random.normal(k_v, (B, S, d_model), jnp.float32)
    mask = jnp.tril(jnp.ones((S, S), jnp.int32))[None].repeat(B, axis=0)

    # 1) cross-attention style call (separate projections) + mask + weights out
    out, weights = multi_head_attention(params, query, key, value, num_heads, mask)
    out = jax.block_until_ready(out)
    weights = jax.block_until_ready(weights)
    ref_out, ref_w = reference_mha(params, query, key, value, num_heads, mask)
    assert out.shape == (B, S, d_model)
    assert weights.shape == (B, num_heads, S, S)
    assert jnp.allclose(out, ref_out, **tol)
    assert jnp.allclose(weights, ref_w, **tol)

    # 2) self-attention fast path (fused QKV projection), no mask, with weights
    out2, w2 = multi_head_attention(params, query, query, query, num_heads, None)
    out2 = jax.block_until_ready(out2)
    ref_out2, ref_w2 = reference_mha(params, query, query, query, num_heads, None)
    assert jnp.allclose(out2, ref_out2, **tol)
    assert jnp.allclose(w2, ref_w2, **tol)

    # 3) flash (online-softmax) path: return_weights=False, with mask
    out3, w3 = multi_head_attention(params, query, query, query, num_heads, mask,
                                    return_weights=False)
    out3 = jax.block_until_ready(out3)
    ref_out3, _ = reference_mha(params, query, query, query, num_heads, mask)
    assert w3 is None
    assert jnp.allclose(out3, ref_out3, **tol)

    # 4) 128-aligned d_model: zero-copy fused-QKV BlockSpec column selection and
    #    multi-tile (q and kv) online softmax.
    B4, S4, dm4, H4 = 1, 256, 128, 8
    p4 = init_mha_params(jax.random.PRNGKey(1), dm4)
    x4 = jax.random.normal(jax.random.PRNGKey(2), (B4, S4, dm4), jnp.float32)
    m4 = jnp.tril(jnp.ones((S4, S4), jnp.int32))[None]
    out4, w4 = multi_head_attention(p4, x4, x4, x4, H4, m4,
                                    return_weights=False,
                                    q_block=128, kv_block=128)
    out4 = jax.block_until_ready(out4)
    ref_out4, _ = reference_mha(p4, x4, x4, x4, H4, m4)
    assert w4 is None
    assert jnp.allclose(out4, ref_out4, **tol)

    # 5) bf16 activations/params (MXU fed bf16 operands natively), flash path
    params_bf16 = jax.tree_util.tree_map(lambda a: a.astype(jnp.bfloat16), params)
    q_bf = query.astype(jnp.bfloat16)
    out5, _ = multi_head_attention(params_bf16, q_bf, q_bf, q_bf, num_heads, mask,
                                   return_weights=False)
    out5 = jax.block_until_ready(out5)
    params_f32 = jax.tree_util.tree_map(lambda a: a.astype(jnp.float32), params_bf16)
    ref_out5, _ = reference_mha(params_f32, q_bf.astype(jnp.float32),
                                q_bf.astype(jnp.float32), q_bf.astype(jnp.float32),
                                num_heads, mask)
    assert out5.dtype == jnp.bfloat16
    assert jnp.allclose(out5.astype(jnp.float32), ref_out5, atol=1e-1, rtol=1e-1)

    print("KERNEL_OK")
</pallas_src>

<mosaic_0001>
module attributes {stable_mosaic.version = 11 : i64} {
  func.func @_matmul_bias_kernel(%arg0: i32, %arg1: i32, %arg2: i32, %arg3: memref<16x32xf32, #tpu.memory_space<vmem>>, %arg4: memref<32x32xf32, #tpu.memory_space<vmem>>, %arg5: memref<1x32xf32, #tpu.memory_space<vmem>>, %arg6: memref<16x32xf32, #tpu.memory_space<vmem>>, %arg7: memref<16x32xf32, #tpu.memory_space<vmem>>) attributes {dimension_semantics = [#tpu.dimension_semantics<parallel>, #tpu.dimension_semantics<parallel>, #tpu.dimension_semantics<arbitrary>], iteration_bounds = array<i64: 1, 1, 1>, scalar_prefetch = 0 : i64, scratch_operands = 1 : i64, tpu.core_type = #tpu.core_type<tc>, window_params = [{transform_indices = @transform_0, window_bounds = array<i64: 16, 32>}, {transform_indices = @transform_1, window_bounds = array<i64: 32, 32>}, {transform_indices = @transform_2, window_bounds = array<i64: 1, 32>}, {transform_indices = @transform_3, window_bounds = array<i64: 16, 32>}]} {
    %c0_i32 = arith.constant 0 : i32
    %0 = arith.cmpi eq, %arg2, %c0_i32 : i32
    %1 = arith.extui %0 : i1 to i32
    %c0_i32_0 = arith.constant 0 : i32
    %2 = arith.cmpi ne, %1, %c0_i32_0 : i32
    scf.if %2 {
      %cst_10 = arith.constant 0.000000e+00 : f32
      %12 = vector.broadcast %cst_10 : f32 to vector<16x32xf32>
      %c0_11 = arith.constant 0 : index
      %c0_12 = arith.constant 0 : index
      %13 = vector.load %arg7[%c0_11, %c0_12] : memref<16x32xf32, #tpu.memory_space<vmem>>, vector<16x32xf32>
      tpu.vector_store %arg7[%c0_11, %c0_12], %12 {strides = array<i32>} : memref<16x32xf32, #tpu.memory_space<vmem>>, vector<16x32xf32>,
    } else {
    }
    %c0 = arith.constant 0 : index
    %c0_1 = arith.constant 0 : index
    %3 = vector.load %arg7[%c0, %c0_1] : memref<16x32xf32, #tpu.memory_space<vmem>>, vector<16x32xf32>
    %c0_2 = arith.constant 0 : index
    %c0_3 = arith.constant 0 : index
    %4 = vector.load %arg3[%c0_2, %c0_3] : memref<16x32xf32, #tpu.memory_space<vmem>>, vector<16x32xf32>
    %c0_4 = arith.constant 0 : index
    %c0_5 = arith.constant 0 : index
    %5 = vector.load %arg4[%c0_4, %c0_5] : memref<32x32xf32, #tpu.memory_space<vmem>>, vector<32x32xf32>
    %cst = arith.constant dense<0.000000e+00> : vector<16x32xf32>
    %6 = tpu.matmul %4, %5, %cst {dimension_numbers = #tpu.dot_dimension_numbers<[1], [0], [0], [1], [0, 0, 1, 1], [], []>} : vector<16x32xf32>, vector<32x32xf32>, vector<16x32xf32> -> vector<16x32xf32>
    %7 = arith.addf %3, %6 : vector<16x32xf32>
    %c0_6 = arith.constant 0 : index
    %c0_7 = arith.constant 0 : index
    %8 = vector.load %arg7[%c0_6, %c0_7] : memref<16x32xf32, #tpu.memory_space<vmem>>, vector<16x32xf32>
    tpu.vector_store %arg7[%c0_6, %c0_7], %7 {strides = array<i32>} : memref<16x32xf32, #tpu.memory_space<vmem>>, vector<16x32xf32>,
    %c0_i32_8 = arith.constant 0 : i32
    %9 = arith.cmpi eq, %arg2, %c0_i32_8 : i32
    %10 = arith.extui %9 : i1 to i32
    %c0_i32_9 = arith.constant 0 : i32
    %11 = arith.cmpi ne, %10, %c0_i32_9 : i32
    scf.if %11 {
      %c0_10 = arith.constant 0 : index
      %c0_11 = arith.constant 0 : index
      %12 = vector.load %arg7[%c0_10, %c0_11] : memref<16x32xf32, #tpu.memory_space<vmem>>, vector<16x32xf32>
      %c0_12 = arith.constant 0 : index
      %c0_13 = arith.constant 0 : index
      %13 = vector.load %arg5[%c0_12, %c0_13] : memref<1x32xf32, #tpu.memory_space<vmem>>, vector<1x32xf32>
      %14 = vector.broadcast %13 : vector<1x32xf32> to vector<16x32xf32>
      %15 = arith.addf %12, %14 : vector<16x32xf32>
      %c0_14 = arith.constant 0 : index
      %c0_15 = arith.constant 0 : index
      %16 = vector.load %arg6[%c0_14, %c0_15] : memref<16x32xf32, #tpu.memory_space<vmem>>, vector<16x32xf32>
      tpu.vector_store %arg6[%c0_14, %c0_15], %15 {strides = array<i32>} : memref<16x32xf32, #tpu.memory_space<vmem>>, vector<16x32xf32>,
    } else {
    }
    return
  }
  func.func @transform_0(%arg0: i32, %arg1: i32, %arg2: i32) -> (i32, i32) {
    %c0_i32 = arith.constant 0 : i32
    return %arg0, %arg2 : i32, i32
  }
  func.func @transform_1(%arg0: i32, %arg1: i32, %arg2: i32) -> (i32, i32) {
    %c0_i32 = arith.constant 0 : i32
    return %arg2, %arg1 : i32, i32
  }
  func.func @transform_2(%arg0: i32, %arg1: i32, %arg2: i32) -> (i32, i32) {
    %c0_i32 = arith.constant 0 : i32
    %c0_i32_0 = arith.constant 0 : i32
    return %c0_i32, %arg1 : i32, i32
  }
  func.func @transform_3(%arg0: i32, %arg1: i32, %arg2: i32) -> (i32, i32) {
    %c0_i32 = arith.constant 0 : i32
    return %arg0, %arg1 : i32, i32
  }
}

</mosaic_0001>

<bundles_post_ra>
// kernel: tpu_custom_call.1
= control target key start
LH: loop header
LB: loop body
LE: loop exit
PB: predicated region body
PF: predicated region fallthrough
CT: control target
= control target key end

     0   :  { %8 = vsyncpa [#allocation4], 0  ;;  %s275_s0 = inlined_call_operand.hbm [shape: f32[16,32], index: 0, kind: input, shape index: {}]   ;;  %s276_s1 = inlined_call_operand.hbm [shape: f32[32,32], index: 1, kind: input, shape index: {}]   ;;  %s277_s2 = inlined_call_operand.vmem [shape: f32[1,32], index: 2, kind: input, shape index: {}]   ;;  %s278_s3 = inlined_call_operand.hbm [shape: f32[16,32], index: 3, kind: output, shape index: {}]  }
   0x1   :  { %9 = vsyncpa [#allocation7], 0 }
   0x2   :  { %10 = vsyncpa [#allocation5], 0  ;;  %s15_s14 = sshll.u32 %s275_s0, 4  ;;  %s220_s15 = smov [#allocation3]   ;;  %s16_s14 = int_to_ptr.hbm [resolvable:$true] %s15_s14 }
   0x3   :  { %s17_s16 = sshll.u32 %s220_s15, 4  ;;  %s28_s19 = sshll.u32 %s276_s1, 4  ;;  %s18_s16 = int_to_ptr.vmem [resolvable:$true] %s17_s16  ;;  %s29_s19 = int_to_ptr.hbm [resolvable:$true] %s28_s19 }
   0x4   :  { %s221_s20 = smov 128   ;;  %s222_s21 = smov 8  }
   0x5   :  { %23 = dma.hbm_to_vmem [thread:$0]  %s16_s14, 256, %s18_s16, [#allocation4], %s221_s20, %s221_s20, %s222_s21  }
   0x6   :  { %s223_s22 = smov [#allocation6]  }
   0x7   :  { %s30_s23 = sshll.u32 %s223_s22, 4  ;;  %s31_s23 = int_to_ptr.vmem [resolvable:$true] %s30_s23 }
   0x8   :  { %36 = dma.hbm_to_vmem [thread:$0]  %s29_s19, 512, %s31_s23, [#allocation7], %s221_s20, %s221_s20, %s222_s21  }
   0x9   :  { %214 = dma.done.wait [#allocation4], 256  }
   0xa   :  { %215 = vsyncadd [#allocation4], 4294967040 }
   0xb   :  { %216 = dma.done.wait [#allocation7], 512  }
   0xc   :  { %217 = vsyncadd [#allocation7], 4294966784  ;;  %vm51_vm0 = vcmask 261120   ;;  %v224_v0 = vmov 0.0   ;;  %v61_v1 = vld [vmem:[#allocation6 + $0x18] sm:$0xff]  ;;  %v60_v2 = vld [vmem:[#allocation6 + $0x10] sm:$0xff] }
   0xd   :  { %52 = vst.msk [vmem:[#allocation2] sm:$0xff] %vm51_vm0, %v224_v0  ;;  %81 = vmatpush.msra.mxu0 %v61_v1  ;;  %131 = vmatpush.msra.mxu1 %v61_v1  ;;  %v59_v3 = vld [vmem:[#allocation6 + $0x8] sm:$0xff]  ;;  %v58_v4 = vld [vmem:[#allocation6] sm:$0xff]  ;;  %v56_v5 = vld [vmem:[#allocation3] sm:$0xff]  ;;  %s225_s24 = smov [#allocation8]   ;;  %s115_s28 = sshll.u32 %s278_s3, 4  ;;  %s116_s28 = int_to_ptr.hbm [resolvable:$true] %s115_s28 }
   0xe   :  { %53 = vst.msk [vmem:[#allocation2 + $0x8] sm:$0xff] %vm51_vm0, %v224_v0  ;;  %v57_v6 = vld [vmem:[#allocation3 + $0x8] sm:$0xff]  ;;  %v141_v13 = vld [vmem:[%s277_s2] ss:$0 sm:$0xff]  ;;  %s113_s25 = sshll.u32 %s225_s24, 4  ;;  %s114_s25 = int_to_ptr.vmem [resolvable:$true] %s113_s25 }
   0xf   :  { %82 = vmatpush.msra.mxu0 %v60_v2  ;;  %132 = vmatpush.msra.mxu1 %v60_v2 }
  0x11   :  { %83 = vmatpush.msra.mxu0 %v59_v3  ;;  %133 = vmatpush.msra.mxu1 %v59_v3 }
  0x13   :  { %84 = vmatpush.msra.mxu0 %v58_v4  ;;  %134 = vmatpush.msra.mxu1 %v58_v4 }
  0x14   :  { %129 = vmatmul.msk.f32.vlgmr.msra.gmra.mxu0 %vm51_vm0, %v56_v5  ;;  %130 = vmatmul.msk.f32.vlgmr.msra.gmra.mxu1 %vm51_vm0, %v57_v6  ;;  %v54_v7 = vld [vmem:[#allocation2] sm:$0xff] }
  0x15   :  { %v55_v8 = vld [vmem:[#allocation2 + $0x8] sm:$0xff] }
  0x91   :  { %v86_v9 = vpop.f32.mrf.mxu0  ;;  %v89_v10 = vpop.f32.mrf.mxu1 }
  0x92   :  { %v92_v11 = vadd.f32 %v86_v9, %v54_v7  ;;  %v93_v12 = vadd.f32 %v89_v10, %v55_v8 }
  0x94   :  { %94 = vst.msk [vmem:[#allocation2] sm:$0xff] %vm51_vm0, %v92_v11 }
  0x95   :  { %95 = vst.msk [vmem:[#allocation2 + $0x8] sm:$0xff] %vm51_vm0, %v93_v12 }
  0x9b   :  { %v99_v14 = vld [vmem:[#allocation2] sm:$0xff] }
  0x9c   :  { %v100_v15 = vld [vmem:[#allocation2 + $0x8] sm:$0xff]  ;;  %v105_v16 = vadd.f32 %v141_v13, %v99_v14 }
  0x9d   :  { %v106_v17 = vadd.f32 %v141_v13, %v100_v15 }
  0x9e   :  { %107 = vst.msk [vmem:[#allocation8] sm:$0xff] %vm51_vm0, %v105_v16 }
  0x9f   :  { %108 = vst.msk [vmem:[#allocation8 + $0x8] sm:$0xff] %vm51_vm0, %v106_v17 }
  0xa0   :  { %121 = dma.vmem_to_hbm [thread:$0]  %s114_s25, 256, %s116_s28, [#allocation5], %s221_s20, %s221_s20, %s222_s21  }
  0xa1   :  { %218 = dma.done.wait [#allocation5], 256  }
  0xa2   :  { %219 = vsyncadd [#allocation5], 4294967040 }
  0xa3   :  { %126 = vsyncpa [#allocation4], 1 }
  0xa4   :  { %127 = vsyncpa [#allocation7], 1 }
  0xa5   :  { %128 = vsyncpa [#allocation5], 1 }

</bundles_post_ra>
